<compile_context>
chip_gen: v7x
topology: tpu7x:2x2x1
jax: 0.10.0
libtpu: 0.0.40
codegen_flags: <defaults>
</compile_context>

<pallas_src>
import jax
import jax.numpy as jnp
from jax.experimental import pallas as pl
from jax.experimental.pallas import tpu as pltpu

_LANES = 128


def _convt1x1_clamp_kernel(x_ref, wt_ref, b_ref, o_ref):
    # x_ref: (Cin, TM)   wt_ref: (Cout, Cin)   b_ref: (Cout, 1)   o_ref: (Cout, TM)
    cout, tm = o_ref.shape
    cin = x_ref.shape[0]

    # bias: lane-broadcast of a (Cout, 1) column
    acc = jnp.broadcast_to(b_ref[...], (cout, tm)).astype(jnp.float32)

    # K=3, N=8 contraction as 3 broadcast FMAs on the VPU.
    # (The MXU would be ~0.02% utilised at these shapes and forces a bad layout.)
    for ci in range(cin):  # static unroll (Cin = 3)
        xi = jnp.broadcast_to(x_ref[pl.ds(ci, 1), :], (cout, tm))   # sublane broadcast
        wc = jnp.broadcast_to(wt_ref[:, pl.ds(ci, 1)], (cout, tm))  # lane broadcast
        acc = acc + wc * xi

    # torch.clamp_min(v, 1) then torch.clamp_max(v, -1).
    # NOTE(perf): min(1) >= max(-1) => every element becomes exactly -1.0; the conv above
    # is mathematically dead work. Kept for faithfulness; see constant_folded_forward().
    acc = jnp.maximum(acc, 1.0)
    acc = jnp.minimum(acc, -1.0)

    o_ref[...] = acc.astype(o_ref.dtype)


def conv_transpose_1x1_clamp(x_nchw, weight, bias):
    """ConvTranspose2d(Cin, Cout, 1, stride=1, padding=1) + clamp_min(1) + clamp_max(-1).

    x_nchw: (N, Cin, H, W); weight: (Cin, Cout, 1, 1) [PyTorch layout]; bias: (Cout,).
    Returns (N, Cout, H-2, W-2).
    """
    n, cin, h, w = x_nchw.shape
    cout = weight.shape[1]
    ho, wo = h - 2, w - 2                     # padding=1 crops one pixel per border
    m = n * ho * wo

    # Channels-on-sublane / spatial-on-lane layout.
    # TODO(synk): for large activations fold this crop/reshape into Element-offset
    # BlockSpec index math instead of materialising a cropped copy; at ~9 KB it is noise.
    x_cm = jnp.transpose(x_nchw[:, :, 1:-1, 1:-1], (1, 0, 2, 3)).reshape(cin, m)
    wt = weight[:, :, 0, 0].T                 # (Cout, Cin)
    b2d = bias.reshape(cout, 1)

    # Lane tile: multiple of 128, capped at 1024 (sweep upward for much larger inputs,
    # budgeting 2x(in+out) double buffers against 32 MiB scoped VMEM on v6e/v7x).
    tm = min(1024, ((m + _LANES - 1) // _LANES) * _LANES)
    m_pad = ((m + tm - 1) // tm) * tm
    x_cm = jnp.pad(x_cm, ((0, 0), (0, m_pad - m)))

    out_cm = pl.pallas_call(
        _convt1x1_clamp_kernel,
        out_shape=jax.ShapeDtypeStruct((cout, m_pad), x_nchw.dtype),
        grid_spec=pltpu.PrefetchScalarGridSpec(
            num_scalar_prefetch=0,
            grid=(m_pad // tm,),
            in_specs=[
                pl.BlockSpec((cin, tm), lambda i: (0, i)),
                pl.BlockSpec((cout, cin), lambda i: (0, 0)),   # resident across grid
                pl.BlockSpec((cout, 1), lambda i: (0, 0)),     # resident across grid
            ],
            out_specs=pl.BlockSpec((cout, tm), lambda i: (0, i)),
        ),
        compiler_params=pltpu.CompilerParams(
            dimension_semantics=("parallel",)),  # independent tiles -> megacore-shardable
    )(x_cm, wt, b2d)

    # (Cout, N*Ho*Wo) -> (N, Cout, Ho, Wo)
    return jnp.transpose(out_cm[:, :m].reshape(cout, n, ho, wo), (1, 0, 2, 3))


def constant_folded_forward(x_nchw, weight, bias):
    """Highest-value optimisation from the review: clamp_min(.,1) then clamp_max(.,-1)
    maps every element to -1, so the whole conv/bias/DMA pipeline is dead work and the
    forward pass reduces to a constant fill."""
    n, _, h, w = x_nchw.shape
    cout = weight.shape[1]
    return jnp.full((n, cout, h - 2, w - 2), -1.0, dtype=x_nchw.dtype)


def _reference(x_nchw, weight, bias):
    """Pure-JAX reference of the PyTorch module (correctness oracle)."""
    xc = x_nchw[:, :, 1:-1, 1:-1]                                  # (N, Cin, Ho, Wo)
    y = jnp.einsum("io,nihw->nohw", weight[:, :, 0, 0], xc) + bias[None, :, None, None]
    y = jnp.maximum(y, 1.0)    # clamp_min(1)
    y = jnp.minimum(y, -1.0)   # clamp_max(-1)
    return y


if __name__ == "__main__":
    key = jax.random.PRNGKey(0)
    kx, kw, kb = jax.random.split(key, 3)

    n, cin, cout, h, w = 2, 3, 8, 16, 16
    x1 = jax.random.normal(kx, (n, cin, h, w), dtype=jnp.float32)

    # PyTorch ConvTranspose2d(3, 8, 1) parameters: weight (Cin, Cout, 1, 1), uniform init.
    bound = 1.0 / (cin ** 0.5)
    weight = jax.random.uniform(kw, (cin, cout, 1, 1), jnp.float32, -bound, bound)
    bias = jax.random.uniform(kb, (cout,), jnp.float32, -bound, bound)

    out = conv_transpose_1x1_clamp(x1, weight, bias)
    jax.block_until_ready(out)

    ref = _reference(x1, weight, bias)
    folded = constant_folded_forward(x1, weight, bias)

    assert out.shape == (n, cout, h - 2, w - 2), out.shape
    assert bool(jnp.allclose(out, ref)), "mismatch vs pure-JAX reference"
    assert bool(jnp.allclose(out, folded)), "mismatch vs constant-folded forward"
    assert bool(jnp.all(out == -1.0))
    print("KERNEL_OK")
</pallas_src>

<mosaic_0001>
module attributes {stable_mosaic.version = 11 : i64} {
  func.func @_convt1x1_clamp_kernel(%arg0: i32, %arg1: memref<3x512xf32, #tpu.memory_space<vmem>>, %arg2: memref<8x3xf32, #tpu.memory_space<vmem>>, %arg3: memref<8x1xf32, #tpu.memory_space<vmem>>, %arg4: memref<8x512xf32, #tpu.memory_space<vmem>>) attributes {dimension_semantics = [#tpu.dimension_semantics<parallel>], iteration_bounds = array<i64: 1>, scalar_prefetch = 0 : i64, scratch_operands = 0 : i64, tpu.core_type = #tpu.core_type<tc>, window_params = [{transform_indices = @transform_0, window_bounds = array<i64: 3, 512>}, {pipeline_mode = #tpu.pipeline_mode<synchronous>, transform_indices = @transform_1, window_bounds = array<i64: 8, 3>}, {pipeline_mode = #tpu.pipeline_mode<synchronous>, transform_indices = @transform_2, window_bounds = array<i64: 8, 1>}, {transform_indices = @transform_3, window_bounds = array<i64: 8, 512>}]} {
    %c0 = arith.constant 0 : index
    %c0_0 = arith.constant 0 : index
    %0 = vector.load %arg3[%c0, %c0_0] : memref<8x1xf32, #tpu.memory_space<vmem>>, vector<8x1xf32>
    %1 = vector.shape_cast %0 : vector<8x1xf32> to vector<8x1xf32>
    %2 = vector.broadcast %1 : vector<8x1xf32> to vector<8x512xf32>
    %c0_1 = arith.constant 0 : index
    %c0_2 = arith.constant 0 : index
    %3 = vector.load %arg1[%c0_1, %c0_2] : memref<3x512xf32, #tpu.memory_space<vmem>>, vector<1x512xf32>
    %4 = vector.shape_cast %3 : vector<1x512xf32> to vector<1x512xf32>
    %5 = vector.broadcast %4 : vector<1x512xf32> to vector<8x512xf32>
    %c0_3 = arith.constant 0 : index
    %c0_4 = arith.constant 0 : index
    %6 = vector.load %arg2[%c0_3, %c0_4] : memref<8x3xf32, #tpu.memory_space<vmem>>, vector<8x1xf32>
    %7 = vector.shape_cast %6 : vector<8x1xf32> to vector<8x1xf32>
    %8 = vector.broadcast %7 : vector<8x1xf32> to vector<8x512xf32>
    %9 = arith.mulf %8, %5 : vector<8x512xf32>
    %10 = arith.addf %2, %9 : vector<8x512xf32>
    %c1 = arith.constant 1 : index
    %c0_5 = arith.constant 0 : index
    %11 = vector.load %arg1[%c1, %c0_5] : memref<3x512xf32, #tpu.memory_space<vmem>>, vector<1x512xf32>
    %12 = vector.shape_cast %11 : vector<1x512xf32> to vector<1x512xf32>
    %13 = vector.broadcast %12 : vector<1x512xf32> to vector<8x512xf32>
    %c0_6 = arith.constant 0 : index
    %c1_7 = arith.constant 1 : index
    %14 = vector.load %arg2[%c0_6, %c1_7] : memref<8x3xf32, #tpu.memory_space<vmem>>, vector<8x1xf32>
    %15 = vector.shape_cast %14 : vector<8x1xf32> to vector<8x1xf32>
    %16 = vector.broadcast %15 : vector<8x1xf32> to vector<8x512xf32>
    %17 = arith.mulf %16, %13 : vector<8x512xf32>
    %18 = arith.addf %10, %17 : vector<8x512xf32>
    %c2 = arith.constant 2 : index
    %c0_8 = arith.constant 0 : index
    %19 = vector.load %arg1[%c2, %c0_8] : memref<3x512xf32, #tpu.memory_space<vmem>>, vector<1x512xf32>
    %20 = vector.shape_cast %19 : vector<1x512xf32> to vector<1x512xf32>
    %21 = vector.broadcast %20 : vector<1x512xf32> to vector<8x512xf32>
    %c0_9 = arith.constant 0 : index
    %c2_10 = arith.constant 2 : index
    %22 = vector.load %arg2[%c0_9, %c2_10] : memref<8x3xf32, #tpu.memory_space<vmem>>, vector<8x1xf32>
    %23 = vector.shape_cast %22 : vector<8x1xf32> to vector<8x1xf32>
    %24 = vector.broadcast %23 : vector<8x1xf32> to vector<8x512xf32>
    %25 = arith.mulf %24, %21 : vector<8x512xf32>
    %26 = arith.addf %18, %25 : vector<8x512xf32>
    %cst = arith.constant 1.000000e+00 : f32
    %27 = vector.broadcast %cst : f32 to vector<8x512xf32>
    %28 = arith.maximumf %26, %27 : vector<8x512xf32>
    %cst_11 = arith.constant -1.000000e+00 : f32
    %29 = vector.broadcast %cst_11 : f32 to vector<8x512xf32>
    %30 = arith.minimumf %28, %29 : vector<8x512xf32>
    %c0_12 = arith.constant 0 : index
    %c0_13 = arith.constant 0 : index
    %31 = vector.load %arg4[%c0_12, %c0_13] : memref<8x512xf32, #tpu.memory_space<vmem>>, vector<8x512xf32>
    tpu.vector_store %arg4[%c0_12, %c0_13], %30 {strides = array<i32>} : memref<8x512xf32, #tpu.memory_space<vmem>>, vector<8x512xf32>,
    return
  }
  func.func @transform_0(%arg0: i32) -> (i32, i32) {
    %c0_i32 = arith.constant 0 : i32
    %c0_i32_0 = arith.constant 0 : i32
    return %c0_i32, %arg0 : i32, i32
  }
  func.func @transform_1(%arg0: i32) -> (i32, i32) {
    %c0_i32 = arith.constant 0 : i32
    %c0_i32_0 = arith.constant 0 : i32
    %c0_i32_1 = arith.constant 0 : i32
    return %c0_i32, %c0_i32_0 : i32, i32
  }
  func.func @transform_2(%arg0: i32) -> (i32, i32) {
    %c0_i32 = arith.constant 0 : i32
    %c0_i32_0 = arith.constant 0 : i32
    %c0_i32_1 = arith.constant 0 : i32
    return %c0_i32, %c0_i32_0 : i32, i32
  }
  func.func @transform_3(%arg0: i32) -> (i32, i32) {
    %c0_i32 = arith.constant 0 : i32
    %c0_i32_0 = arith.constant 0 : i32
    return %c0_i32, %arg0 : i32, i32
  }
}

</mosaic_0001>

<bundles_post_ra>
// kernel: tpu_custom_call.1
= control target key start
LH: loop header
LB: loop body
LE: loop exit
PB: predicated region body
PF: predicated region fallthrough
CT: control target
= control target key end

     0   :  { %v187_v1 = vmov 0   ;;  %v188_v2 = vmov 1   ;;  %s238_s0 = inlined_call_operand.vmem [shape: f32[3,512], index: 0, kind: input, shape index: {}]   ;;  %s239_s1 = inlined_call_operand.vmem [shape: f32[8,3], index: 1, kind: input, shape index: {}]   ;;  %s240_s2 = inlined_call_operand.vmem [shape: f32[8,1], index: 2, kind: input, shape index: {}]   ;;  %s241_s3 = inlined_call_operand.hbm [shape: f32[8,512], index: 3, kind: output, shape index: {}]  }
   0x1   :  { %v43_v0 = vld [vmem:[%s239_s1] sm:$0xff]  ;;  %159 = vset.pattern.permute.xlu0 %v187_v1  ;;  %160 = vset.pattern.permute.xlu1 %v188_v2 }
   0x2   :  { %46 = vperm.xlu0 %159, %v43_v0   ;;  %81 = vperm.xlu1 %160, %v43_v0  }
   0x3   :  { %8 = vsyncpa [#allocation3], 0  ;;  %v15_v3 = vld [vmem:[%s240_s2] sm:$0xff]  ;;  %v189_v4 = vmov 2   ;;  %v23_v5 = vlaneseq }
   0x4   :  { %v21_v11 = vld [vmem:[%s238_s0] ss:$4 sm:$0xf]  ;;  %v153_v12 = vld [vmem:[%s238_s0 + $0x1] ss:$4 sm:$0xf] }
   0x5   :  { %v24_v6 = vshrl.u32 %v23_v5, 7  ;;  %v154_v17 = vld [vmem:[%s238_s0 + $0x2] ss:$4 sm:$0xf]  ;;  %s190_s0 = smov [#allocation2]  }
   0x6   :  { %18 = vperm.xlu0 %159, %v15_v3   ;;  %161 = vset.pattern.permute.xlu1 %v189_v4  ;;  %s145_s20 = sshll.u32 %s190_s0, 4  ;;  %s146_s20 = int_to_ptr.vmem [resolvable:$true] %s145_s20 }
   0x7   :  { %116 = vperm.xlu1 %161, %v43_v0   ;;  %v25_v7 = vsub.s32 0, %v24_v6  ;;  %v29_v8 = vsub.s32 1, %v24_v6  ;;  %v33_v9 = vsub.s32 2, %v24_v6  ;;  %v37_v10 = vsub.s32 3, %v24_v6  ;;  %s163_s21 = scalar_lea.vmem %s146_s20, 512  ;;  %p168_p1 = scmp.lt.s32.totalorder %s146_s20, %s146_s20 }
   0x8   :  { %p164_p0 = scmp.ne.s32.totalorder %s146_s20, %s163_s21  ;;  %p169_p2 = scmp.lt.s32.totalorder %s163_s21, %s163_s21 }
   0x9   :  { %v26_v13 = vrot.slane %v21_v11, %v25_v7  ;;  %v30_v14 = vrot.slane %v21_v11, %v29_v8  ;;  %v34_v15 = vrot.slane %v21_v11, %v33_v9  ;;  %v38_v16 = vrot.slane %v21_v11, %v37_v10 }
   0xa   :  { %162 = vset.pattern.permute.xlu0 %v189_v4  ;;  %v63_v20 = vrot.slane %v153_v12, %v25_v7  ;;  %v67_v21 = vrot.slane %v153_v12, %v29_v8  ;;  %v71_v22 = vrot.slane %v153_v12, %v33_v9  ;;  %v75_v23 = vrot.slane %v153_v12, %v37_v10  ;;  %p170_p3 = por %p169_p2, %p168_p1 }
   0xb   :  { %v98_v24 = vrot.slane %v154_v17, %v25_v7  ;;  %v102_v25 = vrot.slane %v154_v17, %v29_v8  ;;  %v106_v26 = vrot.slane %v154_v17, %v33_v9  ;;  %v110_v27 = vrot.slane %v154_v17, %v37_v10 }
   0xc   :  { %p171_p4 = pnand %p170_p3, %p164_p0 }
  0x81   :  { %v47_v18 = vpop.permute.xlu0 %46  ;;  %v82_v19 = vpop.permute.xlu1 %81 }
  0x82   :  { %v49_v28 = vmul.f32 %v47_v18, %v26_v13  ;;  %v50_v29 = vmul.f32 %v47_v18, %v30_v14  ;;  %v51_v30 = vmul.f32 %v47_v18, %v34_v15  ;;  %v52_v31 = vmul.f32 %v47_v18, %v38_v16 }
  0x83   :  { %v84_v32 = vmul.f32 %v82_v19, %v63_v20  ;;  %v85_v33 = vmul.f32 %v82_v19, %v67_v21  ;;  %v86_v34 = vmul.f32 %v82_v19, %v71_v22  ;;  %v87_v35 = vmul.f32 %v82_v19, %v75_v23 }
  0x85   :  { %v19_v36 = vpop.permute.xlu0 %18 }
  0x86   :  { %v53_v37 = vadd.f32 %v49_v28, %v19_v36  ;;  %v54_v38 = vadd.f32 %v50_v29, %v19_v36  ;;  %v55_v39 = vadd.f32 %v51_v30, %v19_v36  ;;  %v56_v40 = vadd.f32 %v52_v31, %v19_v36  ;;  %v117_v41 = vpop.permute.xlu1 %116 }
  0x87   :  { %v119_v42 = vmul.f32 %v117_v41, %v98_v24  ;;  %v120_v43 = vmul.f32 %v117_v41, %v102_v25  ;;  %v121_v44 = vmul.f32 %v117_v41, %v106_v26  ;;  %v122_v45 = vmul.f32 %v117_v41, %v110_v27 }
  0x88   :  { %v88_v46 = vadd.f32 %v84_v32, %v53_v37  ;;  %v89_v47 = vadd.f32 %v85_v33, %v54_v38  ;;  %v90_v48 = vadd.f32 %v86_v34, %v55_v39  ;;  %v91_v49 = vadd.f32 %v87_v35, %v56_v40 }
  0x8a   :  { %v123_v50 = vadd.f32 %v119_v42, %v88_v46  ;;  %v124_v51 = vadd.f32 %v120_v43, %v89_v47  ;;  %v125_v52 = vadd.f32 %v121_v44, %v90_v48  ;;  %v126_v53 = vadd.f32 %v122_v45, %v91_v49 }
  0x8c   :  { %v127_v54 = vmax.f32 %v123_v50, 1.0  ;;  %v128_v55 = vmax.f32 %v124_v51, 1.0  ;;  %v129_v56 = vmax.f32 %v125_v52, 1.0  ;;  %v130_v57 = vmax.f32 %v126_v53, 1.0 }
  0x8e   :  { %v131_v58 = vmin.f32 %v127_v54, -1.0  ;;  %v132_v59 = vmin.f32 %v128_v55, -1.0  ;;  %v133_v60 = vmin.f32 %v129_v56, -1.0  ;;  %v134_v61 = vmin.f32 %v130_v57, -1.0 }
  0x90   :  { %135 = vst [vmem:[#allocation2] sm:$0xff] %v131_v58  ;;  %136 = vst [vmem:[#allocation2 + $0x8] sm:$0xff] %v132_v59 }
  0x91   :  { %137 = vst [vmem:[#allocation2 + $0x10] sm:$0xff] %v133_v60  ;;  %138 = vst [vmem:[#allocation2 + $0x18] sm:$0xff] %v134_v61 }
  0x92   :  { %174 = shalt.err (!%p171_p4)
}
  0x93   :  { %s175_s24 = scalar_lea.hbm %s241_s3, 512 }
  0x94   :  { %p176_p5 = scmp.ne.s32.totalorder %s241_s3, %s175_s24  ;;  %p179_p6 = scmp.lt.u32.totalorder %s175_s24, %s241_s3 }
  0x96   :  { %p181_p7 = pnand %p179_p6, %p176_p5 }
  0x98   :  { %184 = shalt.err (!%p181_p7)
}
  0x99   :  { %148 = dma.vmem_to_hbm [thread:$0]  %s146_s20, 512, %s241_s3, [#allocation3]  }
  0x9a   :  { %185 = dma.done.wait [#allocation3], 512  }
  0x9b   :  { %186 = vsyncadd [#allocation3], 4294966784 }
  0x9c   :  { %152 = vsyncpa [#allocation3], 1 }

</bundles_post_ra>
